<compile_context>
chip_gen: v5e
topology: v5e:2x2
jax: 0.10.0
libtpu: 0.0.40
codegen_flags: <defaults>
</compile_context>

<pallas_src>
import functools

import jax
import jax.numpy as jnp
from jax.experimental import pallas as pl
from jax.experimental.pallas import tpu as pltpu


def _round_up(v: int, m: int) -> int:
    return ((v + m - 1) // m) * m


def _sum_mean_kernel(batch_ref, x_ref, o_ref, acc_ref, cnt_ref, *, mode, tb, tn):
    """grid = (graph_tiles, channel_tiles, node_tiles)  (node axis innermost).

    batch_ref: (1, TN)  int32 VMEM  — graph id per node (lane-major), -1 = pad
    x_ref:     (TN, TC) f32   VMEM  — node-feature tile
    o_ref:     (TB, TC) f32   VMEM  — pooled output tile
    acc_ref:   (TB, TC) f32   VMEM scratch — running sum
    cnt_ref:   (TB, 1)  f32   VMEM scratch — running node counts (mean only)
    """
    bi = pl.program_id(0)
    ni = pl.program_id(2)

    @pl.when(ni == 0)
    def _init():
        acc_ref[...] = jnp.zeros_like(acc_ref)
        cnt_ref[...] = jnp.zeros_like(cnt_ref)

    # One-hot selector P[b, n] = (graph_id(b) == batch[n]); padded nodes have
    # batch == -1 and never match.  Sum pooling becomes a single MXU matmul.
    gids = bi * tb + jax.lax.broadcasted_iota(jnp.int32, (tb, tn), 0)   # (TB, TN)
    b_ids = batch_ref[...]                                              # (1, TN)
    p = gids == b_ids                                                   # (TB, TN)
    acc_ref[...] += jnp.dot(
        p.astype(x_ref.dtype), x_ref[...], preferred_element_type=jnp.float32
    )
    if mode == "mean":
        cnt_ref[...] += jnp.sum(p.astype(jnp.float32), axis=1, keepdims=True)

    @pl.when(ni == pl.num_programs(2) - 1)
    def _finalize():
        if mode == "mean":
            # Runs once per output tile (off the hot loop), so exact reciprocal
            # is free; clamp avoids div-by-zero for empty/padded graph ids.
            inv = pl.reciprocal(jnp.maximum(cnt_ref[...], 1.0), approx=False)
            o_ref[...] = (acc_ref[...] * inv).astype(o_ref.dtype)
        else:
            o_ref[...] = acc_ref[...].astype(o_ref.dtype)


def _max_kernel(batch_ref, x_ref, o_ref, acc_ref, *, tb):
    """Masked segment-max; static unroll over the TB graphs of this output tile.

    batch_ref: (TN, 1)  int32 VMEM — graph id per node (sublane-major)
    x_ref:     (TN, TC) f32   VMEM
    o_ref:     (TB, TC) f32   VMEM
    acc_ref:   (TB, TC) f32   VMEM scratch — running max
    """
    bi = pl.program_id(0)
    ni = pl.program_id(2)

    @pl.when(ni == 0)
    def _init():
        acc_ref[...] = jnp.full_like(acc_ref, -jnp.inf)

    b_ids = batch_ref[...]                       # (TN, 1)
    x = x_ref[...].astype(jnp.float32)           # (TN, TC)
    neg = jnp.float32(-jnp.inf)
    rows = []
    for r in range(tb):                          # static unroll (TB is small)
        mask = b_ids == (bi * tb + r)            # (TN, 1) broadcast over channels
        rows.append(jnp.max(jnp.where(mask, x, neg), axis=0, keepdims=True))
    acc_ref[...] = jnp.maximum(acc_ref[...], jnp.concatenate(rows, axis=0))

    @pl.when(ni == pl.num_programs(2) - 1)
    def _finalize():
        o_ref[...] = acc_ref[...].astype(o_ref.dtype)


def _segment_pool(x, batch, num_graphs, mode, *, tn_max=512, tc_max=512):
    n, c = x.shape
    x = x.astype(jnp.float32)
    batch = batch.astype(jnp.int32)
    num_graphs = max(int(num_graphs), 1)

    # Tile sizes: output graph tile TB (multiple of 8, sublane-dense), channel
    # tile TC (multiple of 128, lane-dense), node tile TN (multiple of 128 so
    # the lane-major batch block and the x sublane dim are both aligned).
    tb = min(128, _round_up(num_graphs, 8))
    b_pad = _round_up(num_graphs, tb)
    tc = min(tc_max, _round_up(c, 128))
    c_pad = _round_up(c, tc)
    tn = min(tn_max, _round_up(n, 128))
    n_pad = _round_up(n, tn)

    x_p = jnp.zeros((n_pad, c_pad), x.dtype).at[:n, :c].set(x)
    batch_p = jnp.full((n_pad,), -1, dtype=jnp.int32).at[:n].set(batch)

    grid = (b_pad // tb, c_pad // tc, n_pad // tn)
    x_spec = pl.BlockSpec((tn, tc), lambda bi, ci, ni: (ni, ci))
    out_spec = pl.BlockSpec((tb, tc), lambda bi, ci, ni: (bi, ci))

    if mode in ("sum", "mean"):
        kernel = functools.partial(_sum_mean_kernel, mode=mode, tb=tb, tn=tn)
        batch_arg = batch_p.reshape(1, n_pad)          # lane-major for one-hot matmul
        batch_spec = pl.BlockSpec((1, tn), lambda bi, ci, ni: (0, ni))
        scratch = [
            pltpu.VMEM((tb, tc), jnp.float32),
            pltpu.VMEM((tb, 1), jnp.float32),
        ]
    elif mode == "max":
        kernel = functools.partial(_max_kernel, tb=tb)
        batch_arg = batch_p.reshape(n_pad, 1)          # sublane-major: broadcasts over C
        batch_spec = pl.BlockSpec((tn, 1), lambda bi, ci, ni: (ni, 0))
        scratch = [pltpu.VMEM((tb, tc), jnp.float32)]
    else:
        raise ValueError(f"unsupported pooling mode: {mode}")

    out = pl.pallas_call(
        kernel,
        out_shape=jax.ShapeDtypeStruct((b_pad, c_pad), jnp.float32),
        grid_spec=pltpu.PrefetchScalarGridSpec(
            num_scalar_prefetch=0,
            grid=grid,
            in_specs=[batch_spec, x_spec],
            out_specs=out_spec,
            scratch_shapes=scratch,
        ),
        compiler_params=pltpu.CompilerParams(
            dimension_semantics=("parallel", "parallel", "arbitrary"),
            vmem_limit_bytes=32 * 1024 * 1024,
        ),
    )(batch_arg, x_p)

    return out[:num_graphs, :c]


class Pool:
    """JAX/Pallas port of pyg_gym Pool for name in {'sum', 'mean', 'max'}."""

    def __init__(self, in_channels=None, **kwargs):
        for key, value in kwargs.items():
            setattr(self, key, value)
        if self.name == "diffpool":
            # TODO(synk): diffpool (GCN stack + dense_diff_pool) not ported.
            raise NotImplementedError("diffpool branch is not implemented in Pallas")
        self.out_channels = in_channels

    def __call__(self, x, edge_index=None, batch=None, num_graphs=None):
        # x: (N, C) float; batch: (N,) int or None (single graph).
        n, _ = x.shape
        if batch is None:
            batch = jnp.zeros((n,), dtype=jnp.int32)
            if num_graphs is None:
                num_graphs = 1
        if num_graphs is None:
            # Fallback only: requires concrete `batch` (host sync; avoid under jit
            # by passing num_graphs explicitly).
            num_graphs = int(jax.device_get(jnp.max(batch))) + 1
        return _segment_pool(x, batch, int(num_graphs), self.name)


def _reference(x, batch, num_graphs, mode):
    # plain-JAX reference for correctness check
    outs = []
    for b in range(num_graphs):
        m = (batch == b)[:, None]
        if mode == "sum":
            outs.append(jnp.sum(jnp.where(m, x, 0.0), axis=0))
        elif mode == "mean":
            s = jnp.sum(jnp.where(m, x, 0.0), axis=0)
            outs.append(s / jnp.maximum(jnp.sum(m.astype(jnp.float32)), 1.0))
        else:
            outs.append(jnp.max(jnp.where(m, x, -jnp.inf), axis=0))
    return jnp.stack(outs, axis=0)


if __name__ == "__main__":
    key = jax.random.PRNGKey(0)
    N, C, B = 32, 16, 4  # 32 nodes, 16 channels, 4 graphs
    kx, _ = jax.random.split(key)
    x = jax.random.normal(kx, (N, C), dtype=jnp.float32)
    # deterministic, sorted graph assignment: 8 nodes per graph
    batch = jnp.repeat(jnp.arange(B, dtype=jnp.int32), N // B)

    ok = True
    for mode in ("sum", "mean", "max"):
        pool = Pool(in_channels=C, name=mode)
        u = jax.block_until_ready(pool(x, edge_index=None, batch=batch, num_graphs=B))
        ref = _reference(x, batch, B, mode)
        if u.shape != (B, C) or not jnp.allclose(u, ref, atol=1e-5, rtol=1e-5):
            ok = False
            print(f"mismatch for mode={mode}")

    if ok:
        print("KERNEL_OK")
</pallas_src>

<mosaic_0001>
module attributes {stable_mosaic.version = 11 : i64} {
  func.func @_sum_mean_kernel(%arg0: i32, %arg1: i32, %arg2: i32, %arg3: memref<1x128xi32, #tpu.memory_space<vmem>>, %arg4: memref<128x128xf32, #tpu.memory_space<vmem>>, %arg5: memref<8x128xf32, #tpu.memory_space<vmem>>, %arg6: memref<8x128xf32, #tpu.memory_space<vmem>>, %arg7: memref<8x1xf32, #tpu.memory_space<vmem>>) attributes {dimension_semantics = [#tpu.dimension_semantics<parallel>, #tpu.dimension_semantics<parallel>, #tpu.dimension_semantics<arbitrary>], iteration_bounds = array<i64: 1, 1, 1>, scalar_prefetch = 0 : i64, scratch_operands = 2 : i64, tpu.core_type = #tpu.core_type<tc>, window_params = [{transform_indices = @transform_0, window_bounds = array<i64: 1, 128>}, {transform_indices = @transform_1, window_bounds = array<i64: 128, 128>}, {transform_indices = @transform_2, window_bounds = array<i64: 8, 128>}]} {
    %c0_i32 = arith.constant 0 : i32
    %0 = arith.cmpi eq, %arg2, %c0_i32 : i32
    %1 = arith.extui %0 : i1 to i32
    %c0_i32_0 = arith.constant 0 : i32
    %2 = arith.cmpi ne, %1, %c0_i32_0 : i32
    scf.if %2 {
      %cst_10 = arith.constant 0.000000e+00 : f32
      %20 = vector.broadcast %cst_10 : f32 to vector<8x128xf32>
      %c0_11 = arith.constant 0 : index
      %c0_12 = arith.constant 0 : index
      %21 = vector.load %arg6[%c0_11, %c0_12] : memref<8x128xf32, #tpu.memory_space<vmem>>, vector<8x128xf32>
      tpu.vector_store %arg6[%c0_11, %c0_12], %20 {strides = array<i32>} : memref<8x128xf32, #tpu.memory_space<vmem>>, vector<8x128xf32>,
      %cst_13 = arith.constant 0.000000e+00 : f32
      %22 = vector.broadcast %cst_13 : f32 to vector<8x1xf32>
      %c0_14 = arith.constant 0 : index
      %c0_15 = arith.constant 0 : index
      %23 = vector.load %arg7[%c0_14, %c0_15] : memref<8x1xf32, #tpu.memory_space<vmem>>, vector<8x1xf32>
      tpu.vector_store %arg7[%c0_14, %c0_15], %22 {strides = array<i32>} : memref<8x1xf32, #tpu.memory_space<vmem>>, vector<8x1xf32>,
    } else {
    }
    %c8_i32 = arith.constant 8 : i32
    %3 = arith.muli %arg0, %c8_i32 : i32
    %4 = tpu.iota {dimensions = array<i32: 0>} : vector<8x128xi32>
    %5 = vector.broadcast %3 : i32 to vector<8x128xi32>
    %6 = arith.addi %5, %4 : vector<8x128xi32>
    %c0 = arith.constant 0 : index
    %c0_1 = arith.constant 0 : index
    %7 = vector.load %arg3[%c0, %c0_1] : memref<1x128xi32, #tpu.memory_space<vmem>>, vector<1x128xi32>
    %8 = vector.broadcast %7 : vector<1x128xi32> to vector<8x128xi32>
    %9 = arith.cmpi eq, %6, %8 : vector<8x128xi32>
    %c0_2 = arith.constant 0 : index
    %c0_3 = arith.constant 0 : index
    %10 = vector.load %arg6[%c0_2, %c0_3] : memref<8x128xf32, #tpu.memory_space<vmem>>, vector<8x128xf32>
    %11 = arith.extui %9 : vector<8x128xi1> to vector<8x128xi32>
    %12 = arith.sitofp %11 : vector<8x128xi32> to vector<8x128xf32>
    %c0_4 = arith.constant 0 : index
    %c0_5 = arith.constant 0 : index
    %13 = vector.load %arg4[%c0_4, %c0_5] : memref<128x128xf32, #tpu.memory_space<vmem>>, vector<128x128xf32>
    %cst = arith.constant dense<0.000000e+00> : vector<8x128xf32>
    %14 = tpu.matmul %12, %13, %cst {dimension_numbers = #tpu.dot_dimension_numbers<[1], [0], [0], [1], [0, 0, 1, 1], [], []>} : vector<8x128xf32>, vector<128x128xf32>, vector<8x128xf32> -> vector<8x128xf32>
    %15 = arith.addf %10, %14 : vector<8x128xf32>
    %c0_6 = arith.constant 0 : index
    %c0_7 = arith.constant 0 : index
    %16 = vector.load %arg6[%c0_6, %c0_7] : memref<8x128xf32, #tpu.memory_space<vmem>>, vector<8x128xf32>
    tpu.vector_store %arg6[%c0_6, %c0_7], %15 {strides = array<i32>} : memref<8x128xf32, #tpu.memory_space<vmem>>, vector<8x128xf32>,
    %c0_i32_8 = arith.constant 0 : i32
    %17 = arith.cmpi eq, %arg2, %c0_i32_8 : i32
    %18 = arith.extui %17 : i1 to i32
    %c0_i32_9 = arith.constant 0 : i32
    %19 = arith.cmpi ne, %18, %c0_i32_9 : i32
    scf.if %19 {
      %c0_10 = arith.constant 0 : index
      %c0_11 = arith.constant 0 : index
      %20 = vector.load %arg6[%c0_10, %c0_11] : memref<8x128xf32, #tpu.memory_space<vmem>>, vector<8x128xf32>
      %c0_12 = arith.constant 0 : index
      %c0_13 = arith.constant 0 : index
      %21 = vector.load %arg5[%c0_12, %c0_13] : memref<8x128xf32, #tpu.memory_space<vmem>>, vector<8x128xf32>
      tpu.vector_store %arg5[%c0_12, %c0_13], %20 {strides = array<i32>} : memref<8x128xf32, #tpu.memory_space<vmem>>, vector<8x128xf32>,
    } else {
    }
    return
  }
  func.func @transform_0(%arg0: i32, %arg1: i32, %arg2: i32) -> (i32, i32) {
    %c0_i32 = arith.constant 0 : i32
    %c0_i32_0 = arith.constant 0 : i32
    return %c0_i32, %arg2 : i32, i32
  }
  func.func @transform_1(%arg0: i32, %arg1: i32, %arg2: i32) -> (i32, i32) {
    %c0_i32 = arith.constant 0 : i32
    return %arg2, %arg1 : i32, i32
  }
  func.func @transform_2(%arg0: i32, %arg1: i32, %arg2: i32) -> (i32, i32) {
    %c0_i32 = arith.constant 0 : i32
    return %arg0, %arg1 : i32, i32
  }
}

</mosaic_0001>

<bundles_post_ra>
// kernel: tpu_custom_call.1
= control target key start
LH: loop header
LB: loop body
LE: loop exit
PB: predicated region body
PF: predicated region fallthrough
CT: control target
= control target key end

     0   :  { %7 = vsyncpa [#allocation5], 0  ;;  %s239_s0 = inlined_call_operand.hbm [shape: s32[1,128], index: 0, kind: input, shape index: {}]   ;;  %s240_s1 = inlined_call_operand.hbm [shape: f32[128,128], index: 1, kind: input, shape index: {}]   ;;  %s241_s2 = inlined_call_operand.hbm [shape: f32[8,128], index: 2, kind: output, shape index: {}]  }
   0x1   :  { %8 = vsyncpa [#allocation8], 0 }
   0x2   :  { %9 = vsyncpa [#allocation6], 0  ;;  %s15_s11 = sshll.u32 %s239_s0, 4  ;;  %s209_s12 = smov [#allocation4]   ;;  %s16_s11 = int_to_ptr.hbm [resolvable:$true] %s15_s11 }
   0x3   :  { %s17_s13 = sshll.u32 %s209_s12, 4  ;;  %s25_s16 = sshll.u32 %s240_s1, 4  ;;  %s18_s13 = int_to_ptr.vmem [resolvable:$true] %s17_s13  ;;  %s26_s16 = int_to_ptr.hbm [resolvable:$true] %s25_s16 }
   0x4   :  { %20 = dma.hbm_to_vmem [thread:$0]  %s16_s11, 16, %s18_s13, [#allocation5]  }
   0x5   :  { %s210_s17 = smov [#allocation7]   ;;  %s211_s19 = smov 128  }
   0x6   :  { %s27_s18 = sshll.u32 %s210_s17, 4  ;;  %s212_s20 = smov 8   ;;  %s28_s18 = int_to_ptr.vmem [resolvable:$true] %s27_s18 }
   0x7   :  { %33 = dma.hbm_to_vmem [thread:$0]  %s26_s16, 2048, %s28_s18, [#allocation8], %s211_s19, %s211_s19, %s212_s20  }
   0x8   :  { %203 = dma.done.wait [#allocation5], 16  }
   0x9   :  { %204 = vsyncadd [#allocation5], 4294967280 }
   0xa   :  { %205 = dma.done.wait [#allocation8], 2048  }
   0xb   :  { %206 = vsyncadd [#allocation8], 4294965248  ;;  %v75_v0 = vld [vmem:[#allocation7 + $0x78] sm:$0xff]  ;;  %v74_v1 = vld [vmem:[#allocation7 + $0x70] sm:$0xff]  ;;  %v50_v12 = vlaneseq  ;;  %v213_v19 = vmov 1.0   ;;  %s214_s0 = smov [#allocation9]  }
   0xc   :  { %76 = vmatpush.msra.mxu0 %v75_v0  ;;  %v73_v2 = vld [vmem:[#allocation7 + $0x68] sm:$0xff]  ;;  %v72_v3 = vld [vmem:[#allocation7 + $0x60] sm:$0xff]  ;;  %v71_v4 = vld [vmem:[#allocation7 + $0x58] sm:$0xff]  ;;  %s108_s1 = sshll.u32 %s214_s0, 4  ;;  %s110_s23 = sshll.u32 %s241_s2, 4  ;;  %s109_s1 = int_to_ptr.vmem [resolvable:$true] %s108_s1  ;;  %s111_s23 = int_to_ptr.hbm [resolvable:$true] %s110_s23 }
   0xd   :  { %v70_v5 = vld [vmem:[#allocation7 + $0x50] sm:$0xff]  ;;  %v69_v6 = vld [vmem:[#allocation7 + $0x48] sm:$0xff]  ;;  %v68_v7 = vld [vmem:[#allocation7 + $0x40] sm:$0xff]  ;;  %v51_v15 = vshrl.u32 %v50_v12, 7 }
   0xe   :  { %77 = vmatpush.msra.mxu0 %v74_v1  ;;  %v67_v8 = vld [vmem:[#allocation7 + $0x38] sm:$0xff]  ;;  %v66_v9 = vld [vmem:[#allocation7 + $0x30] sm:$0xff]  ;;  %v65_v10 = vld [vmem:[#allocation7 + $0x28] sm:$0xff] }
   0xf   :  { %v64_v11 = vld [vmem:[#allocation7 + $0x20] sm:$0xff]  ;;  %v63_v13 = vld [vmem:[#allocation7 + $0x18] sm:$0xff]  ;;  %v62_v14 = vld [vmem:[#allocation7 + $0x10] sm:$0xff] }
  0x10   :  { %78 = vmatpush.msra.mxu0 %v73_v2  ;;  %v130_v16 = vld [vmem:[#allocation4] ss:$0 sm:$0xff]  ;;  %v61_v17 = vld [vmem:[#allocation7 + $0x8] sm:$0xff]  ;;  %v60_v18 = vld [vmem:[#allocation7] sm:$0xff] }
  0x11   :  { %vm56_vm0 = vcmp.eq.s32.totalorder %v51_v15, %v130_v16 }
  0x12   :  { %79 = vmatpush.msra.mxu0 %v72_v3 }
  0x14   :  { %80 = vmatpush.msra.mxu0 %v71_v4 }
  0x16   :  { %81 = vmatpush.msra.mxu0 %v70_v5 }
  0x18   :  { %82 = vmatpush.msra.mxu0 %v69_v6 }
  0x1a   :  { %83 = vmatpush.msra.mxu0 %v68_v7 }
  0x1c   :  { %84 = vmatpush.msra.mxu0 %v67_v8 }
  0x1e   :  { %85 = vmatpush.msra.mxu0 %v66_v9 }
  0x20   :  { %86 = vmatpush.msra.mxu0 %v65_v10 }
  0x22   :  { %87 = vmatpush.msra.mxu0 %v64_v11 }
  0x24   :  { %88 = vmatpush.msra.mxu0 %v63_v13 }
  0x26   :  { %89 = vmatpush.msra.mxu0 %v62_v14 }
  0x28   :  { %90 = vmatpush.msra.mxu0 %v61_v17 }
  0x2a   :  { %91 = vmatpush.msra.mxu0 %v60_v18 }
  0x2b   :  { %122 = vmatmul.msk.f32.vlgmr.msra.gmra.mxu0 %vm56_vm0, %v213_v19 }
  0xa8   :  { %v93_v20 = vpop.f32.mrf.mxu0 }
  0xa9   :  { %102 = vst [vmem:[#allocation9] sm:$0xff] %v93_v20 }
  0xaa   :  { %113 = dma.vmem_to_hbm [thread:$0]  %s109_s1, 128, %s111_s23, [#allocation6]  }
  0xab   :  { %207 = dma.done.wait [#allocation6], 128  }
  0xac   :  { %208 = vsyncadd [#allocation6], 4294967168 }
  0xad   :  { %118 = vsyncpa [#allocation5], 1 }
  0xae   :  { %119 = vsyncpa [#allocation8], 1 }
  0xaf   :  { %120 = vsyncpa [#allocation6], 1 }

</bundles_post_ra>
